<compile_context>
chip_gen: v7x
topology: tpu7x:2x2x1
jax: 0.10.0
libtpu: 0.0.40
codegen_flags: <defaults>
</compile_context>

<pallas_src>
import functools
import math

import numpy as np
import jax
import jax.numpy as jnp
from jax.experimental import pallas as pl
from jax.experimental.pallas import tpu as pltpu

_VMEM_LIMIT = 32 * 1024 * 1024
_CP = pltpu.CompilerParams(dimension_semantics=("parallel",),
                           vmem_limit_bytes=_VMEM_LIMIT)


# ----------------------------------------------------------------------------
# Pallas kernels
# ----------------------------------------------------------------------------
def _conv_mm(cols, w, b, residuals=(), *, act="none"):
    """cols: (N, P, Kc) bf16, w: (Kc, Cout) bf16, b: (1, Cout) f32,
    residuals: tuple of (N, P, Cout) f32 fused into the epilogue.
    out[n] = act(cols[n] @ w + b + sum(residuals[n]))  -- one MXU dot per sample."""
    N, P, Kc = cols.shape
    Cout = w.shape[-1]
    nres = len(residuals)

    def kernel(*refs):
        c_ref, w_ref, b_ref = refs[0], refs[1], refs[2]
        res_refs = refs[3:3 + nres]
        o_ref = refs[3 + nres]
        acc = jnp.dot(c_ref[0], w_ref[...], preferred_element_type=jnp.float32)
        acc = acc + b_ref[...]
        for r_ref in res_refs:
            acc = acc + r_ref[0]
        if act == "relu":
            acc = jnp.maximum(acc, 0.0)
        o_ref[0] = acc

    in_specs = [pl.BlockSpec((1, P, Kc), lambda n: (n, 0, 0)),
                pl.BlockSpec((Kc, Cout), lambda n: (0, 0)),
                pl.BlockSpec((1, Cout), lambda n: (0, 0))]
    in_specs += [pl.BlockSpec((1, P, Cout), lambda n: (n, 0, 0))
                 for _ in range(nres)]

    return pl.pallas_call(
        kernel,
        out_shape=jax.ShapeDtypeStruct((N, P, Cout), jnp.float32),
        grid=(N,),
        in_specs=in_specs,
        out_specs=pl.BlockSpec((1, P, Cout), lambda n: (n, 0, 0)),
        compiler_params=_CP,
    )(cols, w, b, *residuals)


def _max_over_taps(stk):
    """stk: (N, T, P, C) -> elementwise max over T (stride-2 maxpool reduction)."""
    N, T, P, C = stk.shape

    def kernel(x_ref, o_ref):
        acc = x_ref[0, 0]
        for t in range(1, T):
            acc = jnp.maximum(acc, x_ref[0, t])
        o_ref[0] = acc

    return pl.pallas_call(
        kernel,
        out_shape=jax.ShapeDtypeStruct((N, P, C), jnp.float32),
        grid=(N,),
        in_specs=[pl.BlockSpec((1, T, P, C), lambda n: (n, 0, 0, 0))],
        out_specs=pl.BlockSpec((1, P, C), lambda n: (n, 0, 0)),
        compiler_params=_CP,
    )(stk)


def _bmm(a, x, *, act="none"):
    """a: (M, K) shared, x: (N, K, L) per batch -> (N, M, L) f32.
    Used for bilinear resize and the separable HA blur. Optional fused sigmoid."""
    M, K = a.shape
    N, _, L = x.shape
    a = a.astype(jnp.bfloat16)
    x = x.astype(jnp.bfloat16)

    def kernel(a_ref, x_ref, o_ref):
        r = jnp.dot(a_ref[...], x_ref[0], preferred_element_type=jnp.float32)
        if act == "sigmoid":
            r = jax.nn.sigmoid(r)
        o_ref[0] = r

    return pl.pallas_call(
        kernel,
        out_shape=jax.ShapeDtypeStruct((N, M, L), jnp.float32),
        grid=(N,),
        in_specs=[pl.BlockSpec((M, K), lambda n: (0, 0)),
                  pl.BlockSpec((1, K, L), lambda n: (n, 0, 0))],
        out_specs=pl.BlockSpec((1, M, L), lambda n: (n, 0, 0)),
        compiler_params=_CP,
    )(a, x)


@jax.jit
def _ca_apply(x, resid, w1, b1, w2, b2):
    """RCAB tail: CALayer (GAP -> 1x1 -> ReLU -> 1x1 -> sigmoid -> scale) + residual add."""
    N, H, W, C = x.shape
    Cr = w1.shape[1]

    def kernel(x_ref, r_ref, w1_ref, b1_ref, w2_ref, b2_ref, o_ref):
        xv = x_ref[0]                               # (H, W, C)
        y = jnp.mean(xv, axis=0)                    # (W, C)
        y = jnp.mean(y, axis=0, keepdims=True)      # (1, C)
        z = jnp.maximum(
            jnp.dot(y, w1_ref[...], preferred_element_type=jnp.float32) + b1_ref[...], 0.0)
        s = jax.nn.sigmoid(
            jnp.dot(z, w2_ref[...], preferred_element_type=jnp.float32) + b2_ref[...])
        o_ref[0] = xv * s + r_ref[0]

    xspec = pl.BlockSpec((1, H, W, C), lambda n: (n, 0, 0, 0))
    return pl.pallas_call(
        kernel,
        out_shape=jax.ShapeDtypeStruct(x.shape, jnp.float32),
        grid=(N,),
        in_specs=[xspec, xspec,
                  pl.BlockSpec((C, Cr), lambda n: (0, 0)),
                  pl.BlockSpec((1, Cr), lambda n: (0, 0)),
                  pl.BlockSpec((Cr, C), lambda n: (0, 0)),
                  pl.BlockSpec((1, C), lambda n: (0, 0))],
        out_specs=xspec,
        compiler_params=_CP,
    )(x, resid, w1, b1, w2, b2)


def _ha_apply(soft, att, x):
    """x * max(min_max_norm(soft), att), per sample."""
    N, H, W, C = x.shape

    def kernel(s_ref, a_ref, x_ref, o_ref):
        s = s_ref[0]                                        # (H, W, 1)
        mx = jnp.max(s, axis=(0, 1), keepdims=True)
        mn = jnp.min(s, axis=(0, 1), keepdims=True)
        sn = (s - mn) / (mx - mn + 1e-8)
        o_ref[0] = x_ref[0] * jnp.maximum(sn, a_ref[0])

    sspec = pl.BlockSpec((1, H, W, 1), lambda n: (n, 0, 0, 0))
    xspec = pl.BlockSpec((1, H, W, C), lambda n: (n, 0, 0, 0))
    return pl.pallas_call(
        kernel,
        out_shape=jax.ShapeDtypeStruct(x.shape, jnp.float32),
        grid=(N,),
        in_specs=[sspec, sspec, xspec],
        out_specs=xspec,
        compiler_params=_CP,
    )(soft, att, x)


# ----------------------------------------------------------------------------
# Glue (padding / tap gather / reshape only -- XLA fuses it into one executable per shape)
# ----------------------------------------------------------------------------
def _im2col(x, kernel_size, stride, dilation, padding):
    """x: (N,H,W,Cin) f32 -> cols (N, Ho*Wo, K*K*Cin) bf16; stride/dilation applied here."""
    N, H, W, Cin = x.shape
    K, d, s = kernel_size, dilation, stride
    xp = jnp.pad(x, ((0, 0), (padding, padding), (padding, padding), (0, 0)))
    Hp, Wp = H + 2 * padding, W + 2 * padding
    Ho = (Hp - d * (K - 1) - 1) // s + 1
    Wo = (Wp - d * (K - 1) - 1) // s + 1
    taps = []
    for kh in range(K):
        for kw in range(K):
            h0, w0 = kh * d, kw * d
            tap = xp[:, h0:h0 + s * (Ho - 1) + 1:s, w0:w0 + s * (Wo - 1) + 1:s, :]
            taps.append(tap.reshape(N, Ho * Wo, Cin))
    cols = jnp.concatenate(taps, axis=-1).astype(jnp.bfloat16)
    return cols, Ho, Wo


@functools.partial(jax.jit, static_argnames=("kernel_size", "stride", "dilation",
                                              "padding", "act", "in_relu"))
def conv2d(x, w, b, residuals=(), *, kernel_size, stride=1, dilation=1, padding=0,
           act="none", in_relu=False):
    """Conv (optionally preceded by ReLU on the input) with fused bias / residual(s) / ReLU."""
    N = x.shape[0]
    Cout = w.shape[-1]
    if in_relu:
        x = jnp.maximum(x, 0.0)
    cols, Ho, Wo = _im2col(x, kernel_size, stride, dilation, padding)
    res = tuple(r.reshape(N, Ho * Wo, Cout) for r in residuals)
    out = _conv_mm(cols, w, b, res, act=act)
    return out.reshape(N, Ho, Wo, Cout)


@jax.jit
def classifier_fwd(p, x):
    """Classifier_Module: 4 dilated 3x3 convs summed -> fused into one conv (T=36 taps)."""
    N, H, W, Cin = x.shape
    Cout = p["b"].shape[-1]
    cols = []
    for dil in (3, 6, 12, 18):
        c, _, _ = _im2col(x, 3, 1, dil, dil)
        cols.append(c)
    cols = jnp.concatenate(cols, axis=-1)
    out = _conv_mm(cols, p["w"], p["b"], (), act="none")
    return out.reshape(N, H, W, Cout)


@jax.jit
def maxpool3x3_s2p1(x):
    N, H, W, C = x.shape
    xp = jnp.pad(x, ((0, 0), (1, 1), (1, 1), (0, 0)), constant_values=-1e30)
    Ho = (H + 2 - 3) // 2 + 1
    Wo = (W + 2 - 3) // 2 + 1
    taps = []
    for kh in range(3):
        for kw in range(3):
            tap = xp[:, kh:kh + 2 * (Ho - 1) + 1:2, kw:kw + 2 * (Wo - 1) + 1:2, :]
            taps.append(tap.reshape(N, Ho * Wo, C))
    stk = jnp.stack(taps, axis=1)                       # (N, 9, Ho*Wo, C)
    return _max_over_taps(stk).reshape(N, Ho, Wo, C)


def _resize_matrix(in_size, out_size, align_corners):
    if align_corners and out_size > 1:
        src = np.arange(out_size, dtype=np.float64) * (in_size - 1) / (out_size - 1)
    else:
        scale = in_size / out_size
        src = (np.arange(out_size, dtype=np.float64) + 0.5) * scale - 0.5
        src = np.maximum(src, 0.0)
    src = np.minimum(src, in_size - 1)
    lo = np.floor(src).astype(np.int64)
    hi = np.minimum(lo + 1, in_size - 1)
    frac = src - lo
    m = np.zeros((out_size, in_size), np.float32)
    m[np.arange(out_size), lo] += (1.0 - frac)
    m[np.arange(out_size), hi] += frac
    return m


@functools.partial(jax.jit, static_argnames=("out_h", "out_w", "align_corners", "act"))
def bilinear_resize(x, *, out_h, out_w, align_corners, act="none"):
    N, H, W, C = x.shape
    if H == 1 and W == 1:
        out = jnp.tile(x, (1, out_h, out_w, 1))
        if act == "sigmoid":
            out = jax.nn.sigmoid(out)
        return out
    rh = jnp.asarray(_resize_matrix(H, out_h, align_corners))
    rw = jnp.asarray(_resize_matrix(W, out_w, align_corners))
    t = _bmm(rh, x.reshape(N, H, W * C)).reshape(N, out_h, W, C)
    t = jnp.transpose(t, (0, 2, 1, 3)).reshape(N, W, out_h * C)
    t = _bmm(rw, t, act=act).reshape(N, out_w, out_h, C)   # elementwise act commutes with transpose
    return jnp.transpose(t, (0, 2, 1, 3))


# ----------------------------------------------------------------------------
# HA (holistic attention) -- canonical CPD, separable gaussian
# ----------------------------------------------------------------------------
def _norm_cdf(v):
    return 0.5 * (1.0 + math.erf(v / math.sqrt(2.0)))


def gkern1d(kernlen=31, nsig=4):
    interval = (2 * nsig + 1.0) / kernlen
    xs = np.linspace(-nsig - interval / 2.0, nsig + interval / 2.0, kernlen + 1)
    return np.diff(np.array([_norm_cdf(v) for v in xs]))


def separable_gauss(kernlen=31, nsig=4):
    # gkern = sqrt(outer(k1d,k1d)) / sum  ==  outer(g1, g1)  with  g1 = sqrt(k1d)/sum(sqrt(k1d))
    g1 = np.sqrt(gkern1d(kernlen, nsig))
    return (g1 / g1.sum()).astype(np.float32)


def build_blur_1d(g1, size, pad):
    K = g1.shape[0]
    M = np.zeros((size, size + 2 * pad), np.float32)
    for o in range(size):
        M[o, o:o + K] += g1
    return M


@jax.jit
def ha_forward(blur_h, blur_w, attention, x):
    N, H, W, _ = attention.shape
    pad = (blur_h.shape[1] - blur_h.shape[0]) // 2
    ap = jnp.pad(attention[..., 0], ((0, 0), (pad, pad), (pad, pad)))   # (N, Hp, Wp)
    t = _bmm(blur_h, ap)                       # (N, H, Wp)
    t = jnp.transpose(t, (0, 2, 1))            # (N, Wp, H)
    t = _bmm(blur_w, t)                        # (N, W, H)
    soft = jnp.transpose(t, (0, 2, 1))[..., None]
    return _ha_apply(soft, attention, x)


# ----------------------------------------------------------------------------
# Deterministic parameter construction
# ----------------------------------------------------------------------------
class PGen:
    def __init__(self, seed=0):
        self.rng = np.random.RandomState(seed)

    def conv(self, cin, cout, k, std=None, bias=True):
        std = std if std is not None else 1.0 / math.sqrt(cin * k * k)
        w = self.rng.normal(0.0, std, size=(k * k * cin, cout)).astype(np.float32)
        if bias:
            b = self.rng.normal(0.0, 0.01, size=(1, cout)).astype(np.float32)
        else:
            b = np.zeros((1, cout), np.float32)
        return {"w": jnp.asarray(w, dtype=jnp.bfloat16), "b": jnp.asarray(b)}

    def convbn(self, cin, cout, k):
        std = 1.0 / math.sqrt(cin * k * k)
        w = self.rng.normal(0.0, std, size=(k * k * cin, cout)).astype(np.float32)
        gamma = (1.0 + 0.1 * self.rng.normal(size=(cout,))).astype(np.float32)
        beta = (0.05 * self.rng.normal(size=(cout,))).astype(np.float32)
        scale = gamma / np.sqrt(1.0 + 1e-5)     # running_mean=0, running_var=1 (eval BN fold)
        return {"w": jnp.asarray(w * scale[None, :], dtype=jnp.bfloat16),
                "b": jnp.asarray(beta[None, :])}


def make_bottleneck(gen, cin, planes, stride):
    p = {"c1": gen.convbn(cin, planes, 1),
         "c2": gen.convbn(planes, planes, 3),
         "c3": gen.convbn(planes, planes * 4, 1),
         "stride": stride}
    if stride != 1 or cin != planes * 4:
        p["down"] = gen.convbn(cin, planes * 4, 1)
    return p


def make_layer(gen, cin, planes, blocks, stride):
    layer = [make_bottleneck(gen, cin, planes, stride)]
    for _ in range(blocks - 1):
        layer.append(make_bottleneck(gen, planes * 4, planes, 1))
    return layer


def make_resnet(gen):
    return {"conv1": gen.convbn(3, 64, 7),
            "layer1": make_layer(gen, 64, 64, 3, 1),
            "layer2": make_layer(gen, 256, 128, 4, 2),
            "layer3_1": make_layer(gen, 512, 256, 6, 2),
            "layer3_2": make_layer(gen, 512, 256, 6, 2),
            "layer4_1": make_layer(gen, 1024, 512, 3, 2),
            "layer4_2": make_layer(gen, 1024, 512, 3, 2)}


def make_classifier(gen, cin, ch):
    ws, bs = [], []
    for _ in range(4):
        p = gen.conv(cin, ch, 3, std=0.01)
        ws.append(p["w"])
        bs.append(p["b"])
    # Fused 4-dilation classifier: concat weights along the contraction dim, sum biases.
    return {"w": jnp.concatenate(ws, axis=0),
            "b": bs[0] + bs[1] + bs[2] + bs[3]}


def make_rcu(gen, ch):
    return {"c1": gen.conv(ch, ch, 3), "c2": gen.conv(ch, ch, 3)}


def make_ffb(gen, ch):
    return {"rcu1": make_rcu(gen, ch), "rcu2": make_rcu(gen, ch)}


def make_rcab(gen, ch, reduction=16):
    cr = max(ch // reduction, 1)
    return {"c1": gen.conv(ch, ch, 3), "c2": gen.conv(ch, ch, 3),
            "ca_w1": jnp.asarray(gen.rng.normal(0, 1 / math.sqrt(ch), (ch, cr)).astype(np.float32)),
            "ca_b1": jnp.zeros((1, cr), jnp.float32),
            "ca_w2": jnp.asarray(gen.rng.normal(0, 1 / math.sqrt(cr), (cr, ch)).astype(np.float32)),
            "ca_b2": jnp.zeros((1, ch), jnp.float32)}


def make_decoder(gen, ch):
    return {"conv1": make_classifier(gen, 256, ch),
            "conv2": make_classifier(gen, 512, ch),
            "conv3": make_classifier(gen, 1024, ch),
            "conv4": make_classifier(gen, 2048, ch),
            "rcab": make_rcab(gen, ch),
            "path4": make_ffb(gen, ch), "path3": make_ffb(gen, ch),
            "path2": make_ffb(gen, ch), "path1": make_ffb(gen, ch),
            "oc1": gen.conv(ch, 128, 3), "oc2": gen.conv(128, 32, 3),
            "oc3": gen.conv(32, 1, 1)}


# ----------------------------------------------------------------------------
# Module forwards
# ----------------------------------------------------------------------------
def bottleneck_fwd(p, x):
    out = conv2d(x, p["c1"]["w"], p["c1"]["b"], kernel_size=1, act="relu")
    out = conv2d(out, p["c2"]["w"], p["c2"]["b"], kernel_size=3,
                 stride=p["stride"], padding=1, act="relu")
    if "down" in p:
        identity = conv2d(x, p["down"]["w"], p["down"]["b"], kernel_size=1,
                          stride=p["stride"])
    else:
        identity = x
    # residual add + ReLU fused into the last 1x1 conv
    return conv2d(out, p["c3"]["w"], p["c3"]["b"], (identity,), kernel_size=1, act="relu")


def run_layer(layer_params, x):
    for bp in layer_params:
        x = bottleneck_fwd(bp, x)
    return x


def rcu_fwd(p, x, extra=None):
    # out = conv2(relu(conv1(relu(x)))) + x [+ extra]   (adds fused into conv2)
    out = conv2d(x, p["c1"]["w"], p["c1"]["b"], kernel_size=3, padding=1,
                 act="relu", in_relu=True)
    res = (x,) if extra is None else (x, extra)
    return conv2d(out, p["c2"]["w"], p["c2"]["b"], res, kernel_size=3, padding=1)


def ffb_fwd(p, *xs):
    if len(xs) == 2:
        out = rcu_fwd(p["rcu1"], xs[1], extra=xs[0])   # xs[0] + rcu1(xs[1])
    else:
        out = xs[0]
    out = rcu_fwd(p["rcu2"], out)
    N, H, W, C = out.shape
    return bilinear_resize(out, out_h=2 * H, out_w=2 * W, align_corners=True)


def rcab_fwd(p, x):
    res = conv2d(x, p["c1"]["w"], p["c1"]["b"], kernel_size=3, padding=1, act="relu")
    res = conv2d(res, p["c2"]["w"], p["c2"]["b"], kernel_size=3, padding=1)
    # CALayer scale + residual add fused in one kernel
    return _ca_apply(res, x, p["ca_w1"], p["ca_b1"], p["ca_w2"], p["ca_b2"])


def decoder_fwd(p, x1, x2, x3, x4):
    c1 = classifier_fwd(p["conv1"], x1)
    c2 = classifier_fwd(p["conv2"], x2)
    c3 = classifier_fwd(p["conv3"], x3)
    c4 = classifier_fwd(p["conv4"], x4)
    c4 = rcab_fwd(p["rcab"], c4)
    c4 = ffb_fwd(p["path4"], c4)
    c43 = ffb_fwd(p["path3"], c4, c3)
    c432 = ffb_fwd(p["path2"], c43, c2)
    c4321 = ffb_fwd(p["path1"], c432, c1)
    y = conv2d(c4321, p["oc1"]["w"], p["oc1"]["b"], kernel_size=3, padding=1)
    N, H, W, C = y.shape
    y = bilinear_resize(y, out_h=2 * H, out_w=2 * W, align_corners=False)
    y = conv2d(y, p["oc2"]["w"], p["oc2"]["b"], kernel_size=3, padding=1, act="relu")
    y = conv2d(y, p["oc3"]["w"], p["oc3"]["b"], kernel_size=1)
    return y


def saliency_feat_encoder_forward(params, x_nchw):
    x = jnp.transpose(x_nchw, (0, 2, 3, 1)).astype(jnp.float32)     # NCHW -> NHWC
    rp = params["resnet"]
    x = conv2d(x, rp["conv1"]["w"], rp["conv1"]["b"], kernel_size=7, stride=2,
               padding=3, act="relu")
    x = maxpool3x3_s2p1(x)
    x1 = run_layer(rp["layer1"], x)
    x2 = run_layer(rp["layer2"], x1)
    x3 = run_layer(rp["layer3_1"], x2)
    x4 = run_layer(rp["layer4_1"], x3)

    pred_init = decoder_fwd(params["dec_init"], x1, x2, x3, x4)

    N, Hf, Wf, _ = pred_init.shape
    att = bilinear_resize(pred_init, out_h=Hf // 8, out_w=Wf // 8,
                          align_corners=True, act="sigmoid")        # sigmoid fused
    x2_2 = ha_forward(params["blur_h"], params["blur_w"], att, x2)
    x3_2 = run_layer(rp["layer3_2"], x2_2)
    x4_2 = run_layer(rp["layer4_2"], x3_2)

    pred_ref = decoder_fwd(params["dec_ref"], x1, x2_2, x3_2, x4_2)
    return (jnp.transpose(pred_init, (0, 3, 1, 2)),
            jnp.transpose(pred_ref, (0, 3, 1, 2)))


# ----------------------------------------------------------------------------
if __name__ == "__main__":
    B, H, W = 2, 32, 32          # input must be divisible by 32 (ResNet /32 downsampling)
    channel, latent_dim = 32, 8  # latent_dim unused in this forward path

    x = jax.random.normal(jax.random.PRNGKey(0), (B, 3, H, W), jnp.float32)

    gen = PGen(0)
    g1 = separable_gauss(31, 4)
    params = {
        "resnet": make_resnet(gen),
        "dec_init": make_decoder(gen, channel),
        "dec_ref": make_decoder(gen, channel),
        "blur_h": jnp.asarray(build_blur_1d(g1, H // 8, 15)),
        "blur_w": jnp.asarray(build_blur_1d(g1, W // 8, 15)),
    }

    pred_init, pred_ref = saliency_feat_encoder_forward(params, x)
    (pred_init, pred_ref) = jax.block_until_ready((pred_init, pred_ref))

    assert pred_init.shape == (B, 1, H, W), pred_init.shape
    assert pred_ref.shape == (B, 1, H, W), pred_ref.shape
    assert bool(jnp.all(jnp.isfinite(pred_init))) and bool(jnp.all(jnp.isfinite(pred_ref)))
    print("KERNEL_OK")
</pallas_src>

<mosaic_0001>
module attributes {stable_mosaic.version = 11 : i64} {
  func.func @kernel(%arg0: i32, %arg1: memref<1x256x147xbf16, #tpu.memory_space<vmem>>, %arg2: memref<147x64xbf16, #tpu.memory_space<vmem>>, %arg3: memref<1x64xf32, #tpu.memory_space<vmem>>, %arg4: memref<1x256x64xf32, #tpu.memory_space<vmem>>) attributes {dimension_semantics = [#tpu.dimension_semantics<parallel>], iteration_bounds = array<i64: 2>, scalar_prefetch = 0 : i64, scratch_operands = 0 : i64, tpu.core_type = #tpu.core_type<tc>, window_params = [{transform_indices = @transform_0, window_bounds = array<i64: 1, 256, 147>}, {pipeline_mode = #tpu.pipeline_mode<synchronous>, transform_indices = @transform_1, window_bounds = array<i64: 147, 64>}, {pipeline_mode = #tpu.pipeline_mode<synchronous>, transform_indices = @transform_2, window_bounds = array<i64: 1, 64>}, {transform_indices = @transform_3, window_bounds = array<i64: 1, 256, 64>}]} {
    %c0 = arith.constant 0 : index
    %c0_0 = arith.constant 0 : index
    %c0_1 = arith.constant 0 : index
    %0 = vector.load %arg1[%c0, %c0_0, %c0_1] : memref<1x256x147xbf16, #tpu.memory_space<vmem>>, vector<1x256x147xbf16>
    %1 = vector.shape_cast %0 : vector<1x256x147xbf16> to vector<256x147xbf16>
    %c0_2 = arith.constant 0 : index
    %c0_3 = arith.constant 0 : index
    %2 = vector.load %arg2[%c0_2, %c0_3] : memref<147x64xbf16, #tpu.memory_space<vmem>>, vector<147x64xbf16>
    %cst = arith.constant dense<0.000000e+00> : vector<256x64xf32>
    %3 = tpu.matmul %1, %2, %cst {dimension_numbers = #tpu.dot_dimension_numbers<[1], [0], [0], [1], [0, 0, 1, 1], [], []>} : vector<256x147xbf16>, vector<147x64xbf16>, vector<256x64xf32> -> vector<256x64xf32>
    %c0_4 = arith.constant 0 : index
    %c0_5 = arith.constant 0 : index
    %4 = vector.load %arg3[%c0_4, %c0_5] : memref<1x64xf32, #tpu.memory_space<vmem>>, vector<1x64xf32>
    %5 = vector.broadcast %4 : vector<1x64xf32> to vector<256x64xf32>
    %6 = arith.addf %3, %5 : vector<256x64xf32>
    %cst_6 = arith.constant 0.000000e+00 : f32
    %7 = vector.broadcast %cst_6 : f32 to vector<256x64xf32>
    %8 = arith.maximumf %6, %7 : vector<256x64xf32>
    %c0_7 = arith.constant 0 : index
    %c0_8 = arith.constant 0 : index
    %c0_9 = arith.constant 0 : index
    %9 = vector.load %arg4[%c0_7, %c0_8, %c0_9] : memref<1x256x64xf32, #tpu.memory_space<vmem>>, vector<1x256x64xf32>
    %10 = vector.shape_cast %9 : vector<1x256x64xf32> to vector<256x64xf32>
    %11 = vector.shape_cast %8 : vector<256x64xf32> to vector<1x256x64xf32>
    tpu.vector_store %arg4[%c0_7, %c0_8, %c0_9], %11 {strides = array<i32>} : memref<1x256x64xf32, #tpu.memory_space<vmem>>, vector<1x256x64xf32>,
    return
  }
  func.func @transform_0(%arg0: i32) -> (i32, i32, i32) {
    %c0_i32 = arith.constant 0 : i32
    %c0_i32_0 = arith.constant 0 : i32
    %c0_i32_1 = arith.constant 0 : i32
    return %arg0, %c0_i32, %c0_i32_0 : i32, i32, i32
  }
  func.func @transform_1(%arg0: i32) -> (i32, i32) {
    %c0_i32 = arith.constant 0 : i32
    %c0_i32_0 = arith.constant 0 : i32
    %c0_i32_1 = arith.constant 0 : i32
    return %c0_i32, %c0_i32_0 : i32, i32
  }
  func.func @transform_2(%arg0: i32) -> (i32, i32) {
    %c0_i32 = arith.constant 0 : i32
    %c0_i32_0 = arith.constant 0 : i32
    %c0_i32_1 = arith.constant 0 : i32
    return %c0_i32, %c0_i32_0 : i32, i32
  }
  func.func @transform_3(%arg0: i32) -> (i32, i32, i32) {
    %c0_i32 = arith.constant 0 : i32
    %c0_i32_0 = arith.constant 0 : i32
    %c0_i32_1 = arith.constant 0 : i32
    return %arg0, %c0_i32, %c0_i32_0 : i32, i32, i32
  }
}

</mosaic_0001>

<bundles_post_ra>
// kernel: conv2d.1
= control target key start
LH: loop header
LB: loop body
LE: loop exit
PB: predicated region body
PF: predicated region fallthrough
CT: control target
= control target key end

     0   :  { %8 = vsyncpa [#allocation3], 0  ;;  %s1361_s0 = inlined_call_operand.vmem [shape: bf16[2,256,147], index: 0, kind: input, shape index: {}]   ;;  %s1362_s1 = inlined_call_operand.vmem [shape: bf16[147,64], index: 1, kind: input, shape index: {}]   ;;  %s1363_s2 = inlined_call_operand.vmem [shape: f32[1,64], index: 2, kind: input, shape index: {}]   ;;  %s1364_s3 = inlined_call_operand.hbm [shape: f32[2,256,64], index: 3, kind: output, shape index: {}]  }
   0x1   :  { %10 = vsyncpa [#allocation3 + $0x1], 0  ;;  %s1070_s12 = smov 0   ;;  %s1072_s13 = smov 0  }
   0x2   :  { %s1074_s14 = smov 0   ;;  %s1076_s15 = smov 0  }
   0x3 LB: > { %s1091_s16 = sadd.s32 4294967295, %s1043_s15   ;;  %s787_s17 = sadd.s32 4294967294, %s1043_s15   ;;  %s1043_s15 = sphi %s1076_s15, %s1370_s15   ;;  %s1039_s14 = sphi %s1074_s14, %s1369_s14   ;;  %s1035_s13 = sphi %s1072_s13, %s1368_s13   ;;  %s1031_s12 = sphi %s1070_s12, %s1367_s12  }
   0x4   : > { %s1095_s18 = sadd.s32 1, %s1043_s15   ;;  %s91_s19 = sadd.s32 1, %s1039_s14 }
   0x5   : > { %s88_s20 = ssub.s32 %s1043_s15, %s1095_s18  ;;  %p101_p0 = scmp.ne.s32.totalorder %s1039_s14, %s1035_s13 }
   0x6   : > { %p89_p1 = scmp.eq.s32.totalorder %s88_s20, 0  ;;  %p102_p2 = scmp.eq.s32.totalorder %s1091_s16, 1 }
   0x7   : > { %p107_p3 = scmp.ne.s32.totalorder %s1035_s13, %s1031_s12  ;;  %p108_p4 = scmp.eq.s32.totalorder %s787_s17, 1 }
   0x8   : > { %s1106_s21 = scalar_select %p89_p1, %s1039_s14, %s91_s19  }
   0x9   : > { %p1108_p5 = por %p102_p2, %p101_p0  ;;  %p1112_p6 = por %p108_p4, %p107_p3 }
   0xa   : > { %p790_p7 = scmp.ge.s32.totalorder %s1043_s15, 1  ;;  %p140_p8 = scmp.lt.s32.totalorder %s1043_s15, 3 }
   0xc   : > { %p141_p9 = pnand %p790_p7, %p140_p8 }
   0xd   : > { %v923_v0 = vld [vmem:[%s1362_s1] sm:$0xff] (!%p141_p9)   ;;  %v1045_v1 = vmov (!%p141_p9), 0   ;;  %v924_v2 = vld [vmem:[%s1362_s1 + $0x8] sm:$0xff] (!%p141_p9)   ;;  %v925_v3 = vld [vmem:[%s1362_s1 + $0x10] sm:$0xff] (!%p141_p9)   ;;  %p164_p10 = scmp.lt.s32.totalorder (!%p141_p9), %s1091_s16, 1  ;;  %vm429_vm0 = vcmask (!%p141_p9), 154624  }
   0xe   : > { %144 = sbr.rel (%p141_p9) target bundleno = 343 (0x157), region = 32  ;;  %485 = vmatprep.subr.bf16.mxu0 (!%p141_p9), %v1045_v1  ;;  %860 = vmatprep.subr.bf16.mxu1 (!%p141_p9), %v1045_v1  ;;  %v926_v4 = vld [vmem:[%s1362_s1 + $0x18] sm:$0xff] (!%p141_p9)   ;;  %v927_v6 = vld [vmem:[%s1362_s1 + $0x20] sm:$0xff] (!%p141_p9)   ;;  %v928_v8 = vld [vmem:[%s1362_s1 + $0x28] sm:$0xff] (!%p141_p9)   ;;  %vm478_vm1 = vcmask (!%p141_p9), 1040384   ;;  %vm479_vm2 = vcmask (!%p141_p9), 1041408  }
   0xf   : > { %486 = vmatpush1.bf16.msra.mxu0 (!%p141_p9), %v923_v0  ;;  %870 = vmatpush1.bf16.msra.mxu1 (!%p141_p9), %v923_v0  ;;  %v929_v9 = vld [vmem:[%s1362_s1 + $0x30] sm:$0xff] (!%p141_p9)   ;;  %v930_v10 = vld [vmem:[%s1362_s1 + $0x38] sm:$0xff] (!%p141_p9)   ;;  %v1046_v11 = vmov (!%p141_p9), 65535   ;;  %v931_v13 = vld [vmem:[%s1362_s1 + $0x40] sm:$0xff] (!%p141_p9)   ;;  %s161_s4 = sand.u32 (!%p141_p9), 1, %s1035_s13   ;;  %vm678_vm3 = vcmask (!%p141_p9), 523264  }
  0x10   : > { %487 = vmatprep.subr.bf16.mxu0 (!%p141_p9), %v1045_v1  ;;  %861 = vmatprep.subr.bf16.mxu1 (!%p141_p9), %v1045_v1  ;;  %v480_v12 = vsel (!%p141_p9), %vm478_vm1, 4294967295, %v1046_v11  ;;  %v932_v14 = vld [vmem:[%s1362_s1 + $0x48] ss:$0 sps:$4 sm:$0x33] (!%p141_p9)   ;;  %v1207_v47 = vld [vmem:[%s1363_s2] ss:$0 sm:$0xff] (!%p141_p9) }
  0x11   : > { %v481_v15 = vsel (!%p141_p9), %vm479_vm2, %v480_v12, 0  ;;  %s791_s7 = sshll.u32 (!%p141_p9), %s161_s4, 8  ;;  %s1047_s24 = smov (!%p141_p9), [#allocation2]  }
  0x12   : > { %v483_v16 = vand.u32 (!%p141_p9), %v932_v14, %v481_v15  ;;  %s1215_s8 = scalar_lea.vmem (!%p141_p9), [#allocation2], %s791_s7  ;;  %s985_s25 = sshll.u32 (!%p141_p9), %s1047_s24, 4  ;;  %s986_s25 = int_to_ptr.vmem [resolvable:$false] %s985_s25 }
  0x13   : > { %488 = vmatpush1.bf16.msra.mxu0 (!%p141_p9), %v924_v2  ;;  %871 = vmatpush1.bf16.msra.mxu1 (!%p141_p9), %v924_v2  ;;  %s725_s10 = sshll.u32 (!%p141_p9), %s1215_s8, 4  ;;  %s987_s26 = scalar_lea.vmem (!%p141_p9), %s986_s25, 8192  ;;  %s1308_s10 = int_to_ptr.vmem [resolvable:$true] %s725_s10 }
  0x14   : > { %489 = vmatprep.subr.bf16.mxu0 (!%p141_p9), %v1045_v1  ;;  %862 = vmatprep.subr.bf16.mxu1 (!%p141_p9), %v1045_v1  ;;  %s981_s20 = scalar_lea.vmem (!%p141_p9), %s1308_s10, 4096  ;;  %p988_p0 = scmp.lt.s32.totalorder (!%p141_p9), %s1308_s10, %s986_s25 }
  0x15   : > { %s165_s30 = scalar_select %p164_p10, %s1091_s16, 1 }
  0x16   : > { %p982_p11 = scmp.ne.s32.totalorder %s1308_s10, %s981_s20  ;;  %p989_p1 = scmp.lt.s32.totalorder %s987_s26, %s981_s20 }
  0x17   : > { %490 = vmatpush1.bf16.msra.mxu0 %v925_v3  ;;  %872 = vmatpush1.bf16.msra.mxu1 %v925_v3  ;;  %s858_s6 = sshll.u32 %s165_s30, 8 }
  0x18   : > { %491 = vmatprep.subr.bf16.mxu0 %v1045_v1  ;;  %863 = vmatprep.subr.bf16.mxu1 %v1045_v1  ;;  %s1135_s9 = scalar_lea.vmem %s1361_s0, %s858_s6  ;;  %p983_p12 = pnand %p982_p11, %p1108_p5 }
  0x19   : > { %v935_v5 = vld [vmem:[%s1135_s9 + $0x4] ss:$8 sps:$4 sm:$0xff]   ;;  %v933_v17 = vld [vmem:[%s1135_s9] ss:$8 sps:$4 sm:$0xff]   ;;  %v939_v19 = vld [vmem:[%s1135_s9 + $0x14] ss:$8 sps:$4 sm:$0xff]   ;;  %p990_p2 = por %p989_p1, %p988_p0 }
  0x1a   : > { %v938_v7 = vld [vmem:[%s1135_s9 + $0x84] ss:$8 sps:$4 sm:$0xff]   ;;  %837 = vmatprep.mubr.msk.bf16.mxu0 %vm429_vm0, %v935_v5  ;;  %v936_v18 = vld [vmem:[%s1135_s9 + $0x80] ss:$8 sps:$4 sm:$0xff]   ;;  %v941_v20 = vld [vmem:[%s1135_s9 + $0x94] ss:$8 sps:$4 sm:$0xff]   ;;  %p984_p13 = pneg %p983_p12 }
  0x1b   : > { %492 = vmatpush1.bf16.msra.mxu0 %v926_v4  ;;  %873 = vmatpush1.bf16.msra.mxu1 %v926_v4  ;;  %v943_v21 = vld [vmem:[%s1135_s9 + $0x10] ss:$8 sps:$4 sm:$0xff]   ;;  %v945_v23 = vld [vmem:[%s1135_s9 + $0x24] ss:$8 sps:$4 sm:$0xff]   ;;  %v949_v25 = vld [vmem:[%s1135_s9 + $0x20] ss:$8 sps:$4 sm:$0xff]  }
  0x1c   : > { %493 = vmatprep.subr.bf16.mxu0 %v1045_v1  ;;  %864 = vmatprep.subr.bf16.mxu1 %v1045_v1  ;;  %v944_v22 = vld [vmem:[%s1135_s9 + $0x90] ss:$8 sps:$4 sm:$0xff]   ;;  %v947_v24 = vld [vmem:[%s1135_s9 + $0xa4] ss:$8 sps:$4 sm:$0xff]   ;;  %v950_v26 = vld [vmem:[%s1135_s9 + $0xa0] ss:$8 sps:$4 sm:$0xff]   ;;  %p991_p3 = pnand %p990_p2, %p984_p13 }
  0x1d   : > { %845 = vmatprep.mubr.msk.bf16.mxu1 %vm429_vm0, %v938_v7  ;;  %v951_v27 = vld [vmem:[%s1135_s9 + $0x34] ss:$8 sps:$4 sm:$0xff]   ;;  %v955_v29 = vld [vmem:[%s1135_s9 + $0x30] ss:$8 sps:$4 sm:$0xff]   ;;  %v957_v31 = vld [vmem:[%s1135_s9 + $0x44] ss:$8 sps:$4 sm:$0xff]  }
  0x1e   : > { %v953_v28 = vld [vmem:[%s1135_s9 + $0xb4] ss:$8 sps:$4 sm:$0xff]   ;;  %v956_v30 = vld [vmem:[%s1135_s9 + $0xb0] ss:$8 sps:$4 sm:$0xff]   ;;  %v959_v32 = vld [vmem:[%s1135_s9 + $0xc4] ss:$8 sps:$4 sm:$0xff]  }
  0x1f   : > { %494 = vmatpush1.bf16.msra.mxu0 %v927_v6  ;;  %874 = vmatpush1.bf16.msra.mxu1 %v927_v6  ;;  %v961_v33 = vld [vmem:[%s1135_s9 + $0x40] ss:$8 sps:$4 sm:$0xff]   ;;  %v963_v35 = vld [vmem:[%s1135_s9 + $0x54] ss:$8 sps:$4 sm:$0xff]   ;;  %v967_v37 = vld [vmem:[%s1135_s9 + $0x50] ss:$8 sps:$4 sm:$0xff]  }
  0x20   : > { %495 = vmatprep.subr.bf16.mxu0 %v1045_v1  ;;  %865 = vmatprep.subr.bf16.mxu1 %v1045_v1  ;;  %v962_v34 = vld [vmem:[%s1135_s9 + $0xc0] ss:$8 sps:$4 sm:$0xff]   ;;  %v965_v36 = vld [vmem:[%s1135_s9 + $0xd4] ss:$8 sps:$4 sm:$0xff]   ;;  %v968_v38 = vld [vmem:[%s1135_s9 + $0xd0] ss:$8 sps:$4 sm:$0xff]  }
  0x21   : > { %v969_v39 = vld [vmem:[%s1135_s9 + $0x64] ss:$8 sps:$4 sm:$0xff]   ;;  %v973_v41 = vld [vmem:[%s1135_s9 + $0x60] ss:$8 sps:$4 sm:$0xff]   ;;  %v975_v43 = vld [vmem:[%s1135_s9 + $0x74] ss:$8 sps:$4 sm:$0xff]  }
  0x22   : > { %v971_v40 = vld [vmem:[%s1135_s9 + $0xe4] ss:$8 sps:$4 sm:$0xff]   ;;  %v974_v42 = vld [vmem:[%s1135_s9 + $0xe0] ss:$8 sps:$4 sm:$0xff]   ;;  %v977_v44 = vld [vmem:[%s1135_s9 + $0xf4] ss:$8 sps:$4 sm:$0xff]  }
  0x23   : > { %496 = vmatpush1.bf16.msra.mxu0 %v928_v8  ;;  %875 = vmatpush1.bf16.msra.mxu1 %v928_v8  ;;  %v979_v45 = vld [vmem:[%s1135_s9 + $0x70] ss:$8 sps:$4 sm:$0xff]  }
  0x24   : > { %497 = vmatprep.subr.bf16.mxu0 %v1045_v1  ;;  %866 = vmatprep.subr.bf16.mxu1 %v1045_v1  ;;  %v980_v46 = vld [vmem:[%s1135_s9 + $0xf0] ss:$8 sps:$4 sm:$0xff]   ;;  %s859_s9 = sshll.u32 %s1091_s16, 12  ;;  %s1320_s16 = scalar_lea.sflag [#allocation3], %s161_s4 }
  0x25   : > { %s1306_s19 = scalar_lea.hbm %s1364_s3, %s859_s9 }
  0x27   : > { %498 = vmatpush1.bf16.msra.mxu0 %v929_v9  ;;  %876 = vmatpush1.bf16.msra.mxu1 %v929_v9 }
  0x28   : > { %499 = vmatprep.subr.bf16.mxu0 %v1045_v1  ;;  %867 = vmatprep.subr.bf16.mxu1 %v1045_v1 }
  0x2b   : > { %500 = vmatpush1.bf16.msra.mxu0 %v930_v10  ;;  %877 = vmatpush1.bf16.msra.mxu1 %v930_v10 }
  0x2c   : > { %501 = vmatprep.subr.bf16.mxu0 %v1045_v1  ;;  %868 = vmatprep.subr.bf16.mxu1 %v1045_v1 }
  0x2f   : > { %502 = vmatpush1.bf16.msra.mxu0 %v931_v13  ;;  %878 = vmatpush1.bf16.msra.mxu1 %v931_v13 }
  0x30   : > { %503 = vmatprep.subr.bf16.mxu0 %v1045_v1  ;;  %869 = vmatprep.subr.bf16.mxu1 %v1045_v1 }
  0x33   : > { %504 = vmatpush1.bf16.msra.mxu0 %v483_v16  ;;  %879 = vmatpush1.bf16.msra.mxu1 %v483_v16 }
  0x36   : > { %518 = vmatmul.mubr.bf16.vlgmr.msra.gmra.mrb[0].mxu0 %v933_v17  ;;  %582 = vmatmul.mubr.bf16.vlgmr.msra.gmra.mrb[0].mxu1 %v936_v18 }
  0x37   : > { %838 = vmatprep.mubr.msk.bf16.mxu0 %vm429_vm0, %v939_v19  ;;  %846 = vmatprep.mubr.msk.bf16.mxu1 %vm429_vm0, %v941_v20 }
  0x3e   : > { %526 = vmatmul.mubr.bf16.gmra.mrb[4].mxu0 %v943_v21  ;;  %590 = vmatmul.mubr.bf16.gmra.mrb[4].mxu1 %v944_v22 }
  0x3f   : > { %839 = vmatprep.mubr.msk.bf16.mxu0 %vm429_vm0, %v945_v23  ;;  %847 = vmatprep.mubr.msk.bf16.mxu1 %vm429_vm0, %v947_v24 }
  0x46   : > { %534 = vmatmul.mubr.bf16.gmra.mrb[8].mxu0 %v949_v25  ;;  %598 = vmatmul.mubr.bf16.gmra.mrb[8].mxu1 %v950_v26 }
  0x47   : > { %840 = vmatprep.mubr.msk.bf16.mxu0 %vm429_vm0, %v951_v27  ;;  %848 = vmatprep.mubr.msk.bf16.mxu1 %vm429_vm0, %v953_v28 }
  0x4e   : > { %542 = vmatmul.mubr.bf16.gmra.mrb[12].mxu0 %v955_v29  ;;  %606 = vmatmul.mubr.bf16.gmra.mrb[12].mxu1 %v956_v30 }
  0x4f   : > { %841 = vmatprep.mubr.msk.bf16.mxu0 %vm429_vm0, %v957_v31  ;;  %849 = vmatprep.mubr.msk.bf16.mxu1 %vm429_vm0, %v959_v32 }
  0x56   : > { %550 = vmatmul.mubr.bf16.gmra.mrb[16].mxu0 %v961_v33  ;;  %614 = vmatmul.mubr.bf16.gmra.mrb[16].mxu1 %v962_v34 }
  0x57   : > { %842 = vmatprep.mubr.msk.bf16.mxu0 %vm429_vm0, %v963_v35  ;;  %850 = vmatprep.mubr.msk.bf16.mxu1 %vm429_vm0, %v965_v36 }
  0x5e   : > { %558 = vmatmul.mubr.bf16.gmra.mrb[20].mxu0 %v967_v37  ;;  %622 = vmatmul.mubr.bf16.gmra.mrb[20].mxu1 %v968_v38 }
  0x5f   : > { %843 = vmatprep.mubr.msk.bf16.mxu0 %vm429_vm0, %v969_v39  ;;  %851 = vmatprep.mubr.msk.bf16.mxu1 %vm429_vm0, %v971_v40 }
  0x66   : > { %566 = vmatmul.mubr.bf16.gmra.mrb[24].mxu0 %v973_v41  ;;  %630 = vmatmul.mubr.bf16.gmra.mrb[24].mxu1 %v974_v42 }
  0x67   : > { %844 = vmatprep.mubr.msk.bf16.mxu0 %vm429_vm0, %v975_v43  ;;  %852 = vmatprep.mubr.msk.bf16.mxu1 %vm429_vm0, %v977_v44 }
  0x6e   : > { %574 = vmatmul.mubr.bf16.gmra.mrb[28].mxu0 %v979_v45  ;;  %638 = vmatmul.mubr.bf16.gmra.mrb[28].mxu1 %v980_v46 }
 0x109   : > { %v519_v48 = vpop.f32.mrb[0].mxu0  ;;  %v583_v49 = vpop.f32.mrb[0].mxu1 }
 0x10a   : > { %v520_v50 = vadd.f32 %v1207_v47, %v519_v48  ;;  %v584_v51 = vadd.f32 %v1207_v47, %v583_v49  ;;  %v521_v52 = vpop.f32.mrb[1].mxu0  ;;  %v585_v53 = vpop.f32.mrb[1].mxu1 }
 0x10b   : > { %v522_v54 = vpop.f32.mrb[2].mxu0  ;;  %v586_v55 = vpop.f32.mrb[2].mxu1 }
 0x10c   : > { %v646_v56 = vmax.f32 %v520_v50, 0.0  ;;  %v662_v57 = vmax.f32 %v584_v51, 0.0  ;;  %v523_v58 = vadd.f32 %v1207_v47, %v522_v54  ;;  %v587_v59 = vadd.f32 %v1207_v47, %v586_v55  ;;  %v524_v60 = vpop.f32.mrb[3].mxu0  ;;  %v588_v61 = vpop.f32.mrb[3].mxu1 }
 0x10e   : > { %679 = vst.msk [vmem:[%s1215_s8] sm:$0xff] %vm678_vm3, %v646_v56  ;;  %695 = vst.msk [vmem:[%s1215_s8 + $0x80] sm:$0xff] %vm678_vm3, %v662_v57  ;;  %v647_v62 = vmax.f32 %v523_v58, 0.0  ;;  %v663_v63 = vmax.f32 %v587_v59, 0.0 }
 0x110   : > { %680 = vst.msk [vmem:[%s1215_s8 + $0x8] sm:$0xff] %vm678_vm3, %v647_v62  ;;  %696 = vst.msk [vmem:[%s1215_s8 + $0x88] sm:$0xff] %vm678_vm3, %v663_v63 }
 0x111   : > { %v527_v0 = vpop.f32.mrb[4].mxu0  ;;  %v591_v1 = vpop.f32.mrb[4].mxu1 }
 0x112   : > { %v528_v2 = vadd.f32 %v1207_v47, %v527_v0  ;;  %v592_v3 = vadd.f32 %v1207_v47, %v591_v1  ;;  %v529_v4 = vpop.f32.mrb[5].mxu0  ;;  %v593_v5 = vpop.f32.mrb[5].mxu1 }
 0x113   : > { %v530_v6 = vpop.f32.mrb[6].mxu0  ;;  %v594_v7 = vpop.f32.mrb[6].mxu1 }
 0x114   : > { %v648_v8 = vmax.f32 %v528_v2, 0.0  ;;  %v664_v9 = vmax.f32 %v592_v3, 0.0  ;;  %v531_v10 = vadd.f32 %v1207_v47, %v530_v6  ;;  %v595_v11 = vadd.f32 %v1207_v47, %v594_v7  ;;  %v532_v12 = vpop.f32.mrb[7].mxu0  ;;  %v596_v13 = vpop.f32.mrb[7].mxu1 }
 0x116   : > { %681 = vst.msk [vmem:[%s1215_s8 + $0x10] sm:$0xff] %vm678_vm3, %v648_v8  ;;  %697 = vst.msk [vmem:[%s1215_s8 + $0x90] sm:$0xff] %vm678_vm3, %v664_v9  ;;  %v649_v14 = vmax.f32 %v531_v10, 0.0  ;;  %v665_v15 = vmax.f32 %v595_v11, 0.0 }
 0x118   : > { %682 = vst.msk [vmem:[%s1215_s8 + $0x18] sm:$0xff] %vm678_vm3, %v649_v14  ;;  %698 = vst.msk [vmem:[%s1215_s8 + $0x98] sm:$0xff] %vm678_vm3, %v665_v15 }
 0x119   : > { %v535_v16 = vpop.f32.mrb[8].mxu0  ;;  %v599_v17 = vpop.f32.mrb[8].mxu1 }
 0x11a   : > { %v536_v18 = vadd.f32 %v1207_v47, %v535_v16  ;;  %v600_v19 = vadd.f32 %v1207_v47, %v599_v17  ;;  %v537_v20 = vpop.f32.mrb[9].mxu0  ;;  %v601_v21 = vpop.f32.mrb[9].mxu1 }
 0x11b   : > { %v538_v22 = vpop.f32.mrb[10].mxu0  ;;  %v602_v23 = vpop.f32.mrb[10].mxu1 }
 0x11c   : > { %v650_v24 = vmax.f32 %v536_v18, 0.0  ;;  %v666_v25 = vmax.f32 %v600_v19, 0.0  ;;  %v539_v26 = vadd.f32 %v1207_v47, %v538_v22  ;;  %v603_v27 = vadd.f32 %v1207_v47, %v602_v23  ;;  %v540_v28 = vpop.f32.mrb[11].mxu0  ;;  %v604_v29 = vpop.f32.mrb[11].mxu1 }
 0x11e   : > { %683 = vst.msk [vmem:[%s1215_s8 + $0x20] sm:$0xff] %vm678_vm3, %v650_v24  ;;  %699 = vst.msk [vmem:[%s1215_s8 + $0xa0] sm:$0xff] %vm678_vm3, %v666_v25  ;;  %v651_v30 = vmax.f32 %v539_v26, 0.0  ;;  %v667_v31 = vmax.f32 %v603_v27, 0.0 }
 0x120   : > { %684 = vst.msk [vmem:[%s1215_s8 + $0x28] sm:$0xff] %vm678_vm3, %v651_v30  ;;  %700 = vst.msk [vmem:[%s1215_s8 + $0xa8] sm:$0xff] %vm678_vm3, %v667_v31 }
 0x121   : > { %v543_v32 = vpop.f32.mrb[12].mxu0  ;;  %v607_v33 = vpop.f32.mrb[12].mxu1 }
 0x122   : > { %v544_v34 = vadd.f32 %v1207_v47, %v543_v32  ;;  %v608_v35 = vadd.f32 %v1207_v47, %v607_v33  ;;  %v545_v36 = vpop.f32.mrb[13].mxu0  ;;  %v609_v37 = vpop.f32.mrb[13].mxu1 }
 0x123   : > { %v546_v38 = vpop.f32.mrb[14].mxu0  ;;  %v610_v39 = vpop.f32.mrb[14].mxu1 }
 0x124   : > { %v652_v40 = vmax.f32 %v544_v34, 0.0  ;;  %v668_v41 = vmax.f32 %v608_v35, 0.0  ;;  %v547_v42 = vadd.f32 %v1207_v47, %v546_v38  ;;  %v611_v43 = vadd.f32 %v1207_v47, %v610_v39  ;;  %v548_v44 = vpop.f32.mrb[15].mxu0  ;;  %v612_v45 = vpop.f32.mrb[15].mxu1 }
 0x126   : > { %685 = vst.msk [vmem:[%s1215_s8 + $0x30] sm:$0xff] %vm678_vm3, %v652_v40  ;;  %701 = vst.msk [vmem:[%s1215_s8 + $0xb0] sm:$0xff] %vm678_vm3, %v668_v41  ;;  %v653_v46 = vmax.f32 %v547_v42, 0.0  ;;  %v669_v48 = vmax.f32 %v611_v43, 0.0 }
 0x128   : > { %686 = vst.msk [vmem:[%s1215_s8 + $0x38] sm:$0xff] %vm678_vm3, %v653_v46  ;;  %702 = vst.msk [vmem:[%s1215_s8 + $0xb8] sm:$0xff] %vm678_vm3, %v669_v48 }
 0x129   : > { %v551_v49 = vpop.f32.mrb[16].mxu0  ;;  %v615_v50 = vpop.f32.mrb[16].mxu1 }
 0x12a   : > { %v552_v51 = vadd.f32 %v1207_v47, %v551_v49  ;;  %v616_v52 = vadd.f32 %v1207_v47, %v615_v50  ;;  %v553_v53 = vpop.f32.mrb[17].mxu0  ;;  %v617_v54 = vpop.f32.mrb[17].mxu1 }
 0x12b   : > { %v554_v55 = vpop.f32.mrb[18].mxu0  ;;  %v618_v56 = vpop.f32.mrb[18].mxu1 }
 0x12c   : > { %v654_v57 = vmax.f32 %v552_v51, 0.0  ;;  %v670_v58 = vmax.f32 %v616_v52, 0.0  ;;  %v555_v59 = vadd.f32 %v1207_v47, %v554_v55  ;;  %v619_v60 = vadd.f32 %v1207_v47, %v618_v56  ;;  %v556_v61 = vpop.f32.mrb[19].mxu0  ;;  %v620_v62 = vpop.f32.mrb[19].mxu1 }
 0x12e   : > { %687 = vst.msk [vmem:[%s1215_s8 + $0x40] sm:$0xff] %vm678_vm3, %v654_v57  ;;  %703 = vst.msk [vmem:[%s1215_s8 + $0xc0] sm:$0xff] %vm678_vm3, %v670_v58  ;;  %v655_v63 = vmax.f32 %v555_v59, 0.0  ;;  %v671_v0 = vmax.f32 %v619_v60, 0.0 }
 0x130   : > { %688 = vst.msk [vmem:[%s1215_s8 + $0x48] sm:$0xff] %vm678_vm3, %v655_v63  ;;  %704 = vst.msk [vmem:[%s1215_s8 + $0xc8] sm:$0xff] %vm678_vm3, %v671_v0 }
 0x131   : > { %v559_v1 = vpop.f32.mrb[20].mxu0  ;;  %v623_v2 = vpop.f32.mrb[20].mxu1 }
 0x132   : > { %v560_v3 = vadd.f32 %v1207_v47, %v559_v1  ;;  %v624_v4 = vadd.f32 %v1207_v47, %v623_v2  ;;  %v561_v5 = vpop.f32.mrb[21].mxu0  ;;  %v625_v6 = vpop.f32.mrb[21].mxu1 }
 0x133   : > { %v562_v7 = vpop.f32.mrb[22].mxu0  ;;  %v626_v8 = vpop.f32.mrb[22].mxu1 }
 0x134   : > { %v656_v9 = vmax.f32 %v560_v3, 0.0  ;;  %v672_v10 = vmax.f32 %v624_v4, 0.0  ;;  %v563_v11 = vadd.f32 %v1207_v47, %v562_v7  ;;  %v627_v12 = vadd.f32 %v1207_v47, %v626_v8  ;;  %v564_v13 = vpop.f32.mrb[23].mxu0  ;;  %v628_v14 = vpop.f32.mrb[23].mxu1 }
 0x136   : > { %689 = vst.msk [vmem:[%s1215_s8 + $0x50] sm:$0xff] %vm678_vm3, %v656_v9  ;;  %705 = vst.msk [vmem:[%s1215_s8 + $0xd0] sm:$0xff] %vm678_vm3, %v672_v10  ;;  %v657_v15 = vmax.f32 %v563_v11, 0.0  ;;  %v673_v16 = vmax.f32 %v627_v12, 0.0 }
 0x138   : > { %690 = vst.msk [vmem:[%s1215_s8 + $0x58] sm:$0xff] %vm678_vm3, %v657_v15  ;;  %706 = vst.msk [vmem:[%s1215_s8 + $0xd8] sm:$0xff] %vm678_vm3, %v673_v16 }
 0x139   : > { %v567_v17 = vpop.f32.mrb[24].mxu0  ;;  %v631_v18 = vpop.f32.mrb[24].mxu1 }
 0x13a   : > { %v568_v19 = vadd.f32 %v1207_v47, %v567_v17  ;;  %v632_v20 = vadd.f32 %v1207_v47, %v631_v18  ;;  %v569_v21 = vpop.f32.mrb[25].mxu0  ;;  %v633_v22 = vpop.f32.mrb[25].mxu1 }
 0x13b   : > { %v570_v23 = vpop.f32.mrb[26].mxu0  ;;  %v634_v24 = vpop.f32.mrb[26].mxu1 }
 0x13c   : > { %v658_v25 = vmax.f32 %v568_v19, 0.0  ;;  %v674_v26 = vmax.f32 %v632_v20, 0.0  ;;  %v571_v27 = vadd.f32 %v1207_v47, %v570_v23  ;;  %v635_v28 = vadd.f32 %v1207_v47, %v634_v24  ;;  %v572_v29 = vpop.f32.mrb[27].mxu0  ;;  %v636_v30 = vpop.f32.mrb[27].mxu1 }
 0x13e   : > { %691 = vst.msk [vmem:[%s1215_s8 + $0x60] sm:$0xff] %vm678_vm3, %v658_v25  ;;  %707 = vst.msk [vmem:[%s1215_s8 + $0xe0] sm:$0xff] %vm678_vm3, %v674_v26  ;;  %v659_v31 = vmax.f32 %v571_v27, 0.0  ;;  %v675_v32 = vmax.f32 %v635_v28, 0.0 }
 0x140   : > { %692 = vst.msk [vmem:[%s1215_s8 + $0x68] sm:$0xff] %vm678_vm3, %v659_v31  ;;  %708 = vst.msk [vmem:[%s1215_s8 + $0xe8] sm:$0xff] %vm678_vm3, %v675_v32 }
 0x141   : > { %v575_v33 = vpop.f32.mrb[28].mxu0  ;;  %v639_v34 = vpop.f32.mrb[28].mxu1 }
 0x142   : > { %v576_v35 = vadd.f32 %v1207_v47, %v575_v33  ;;  %v640_v36 = vadd.f32 %v1207_v47, %v639_v34  ;;  %v577_v37 = vpop.f32.mrb[29].mxu0  ;;  %v641_v38 = vpop.f32.mrb[29].mxu1 }
 0x143   : > { %v578_v39 = vpop.f32.mrb[30].mxu0  ;;  %v642_v40 = vpop.f32.mrb[30].mxu1 }
 0x144   : > { %v660_v41 = vmax.f32 %v576_v35, 0.0  ;;  %v676_v42 = vmax.f32 %v640_v36, 0.0  ;;  %v579_v43 = vadd.f32 %v1207_v47, %v578_v39  ;;  %v643_v44 = vadd.f32 %v1207_v47, %v642_v40  ;;  %v580_v45 = vpop.f32.mrb[31].mxu0  ;;  %v644_v46 = vpop.f32.mrb[31].mxu1 }
 0x146   : > { %693 = vst.msk [vmem:[%s1215_s8 + $0x70] sm:$0xff] %vm678_vm3, %v660_v41  ;;  %709 = vst.msk [vmem:[%s1215_s8 + $0xf0] sm:$0xff] %vm678_vm3, %v676_v42  ;;  %v661_v48 = vmax.f32 %v579_v43, 0.0  ;;  %v677_v49 = vmax.f32 %v643_v44, 0.0 }
 0x148   : > { %694 = vst.msk [vmem:[%s1215_s8 + $0x78] sm:$0xff] %vm678_vm3, %v661_v48  ;;  %710 = vst.msk [vmem:[%s1215_s8 + $0xf8] sm:$0xff] %vm678_vm3, %v677_v49 }
 0x149   : > { %994 = shalt.err (!%p991_p3)
}
 0x14a   : > { %s995_s27 = scalar_lea.hbm %s1306_s19, 4096  ;;  %s999_s30 = scalar_lea.hbm %s1364_s3, 8192 }
 0x14b   : > { %p996_p4 = scmp.ne.s32.totalorder %s1306_s19, %s995_s27  ;;  %p1000_p9 = scmp.lt.u32.totalorder %s1306_s19, %s1364_s3 }
 0x14c   : > { %p1001_p10 = scmp.lt.u32.totalorder %s999_s30, %s995_s27  ;;  %p1003_p12 = scmp.lt.u32.totalorder %s995_s27, %s1306_s19 }
 0x14d   : > { %p997_p7 = pnand %p996_p4, %p1108_p5 }
 0x14e   : > { %p1002_p11 = por %p1001_p10, %p1000_p9 }
 0x14f   : > { %p998_p8 = pneg %p997_p7 }
 0x150   : > { %p1004_p13 = por %p1003_p12, %p1002_p11 }
 0x152   : > { %p1005_p0 = pnand %p1004_p13, %p998_p8 }
 0x154   : > { %1008 = shalt.err (!%p1005_p0)
}
 0x155   : > { %s1048_s6 = smov 128   ;;  %s1049_s7 = smov 8  }
 0x156   : > { %880 = dma.vmem_to_hbm [thread:$0]  (%p1108_p5), %s1308_s10, 4096, %s1306_s19, %s1320_s16, %s1048_s6, %s1048_s6, %s1049_s7  }
 0x157 PF: > { %p886_p1 = scmp.ge.s32.totalorder %s1043_s15, 2  ;;  %s740_s8 = sand.u32 1, %s1031_s12  }
 0x158   : > { %s741_s9 = scalar_lea.sflag [#allocation3], %s740_s8 }
 0x159   : > { %p883_p2 = pnand %p886_p1, %p1112_p6 }
 0x15b   : > { %1026 = dma.done.wait (!%p883_p2), %s741_s9, 4096  }
 0x15c   : > { %1028 = vsyncadd (!%p883_p2), %s741_s9, 4294963200  ;;  %p13_p3 = scmp.ge.s32.totalorder %s1095_s18, 4   ;;  %s1367_s12 = smov %s1035_s13 }
 0x15d   : > { %s1368_s13 = smov %s1039_s14  ;;  %s1369_s14 = smov %s1106_s21 }
 0x15e   : > { %s1370_s15 = smov %s1095_s18  ;;  %15 = sbr.rel (!%p13_p3) target bundleno = 3 (0x3), region = 67 }
 0x165   :  { %746 = vsyncpa [#allocation3], 1 }
 0x166   :  { %748 = vsyncpa [#allocation3 + $0x1], 1 }

</bundles_post_ra>
